<compile_context>
chip_gen: v6e
topology: v6e:2x2x1
jax: 0.10.0
libtpu: 0.0.40
codegen_flags: <defaults>
</compile_context>

<pallas_src>
import functools
import math

import jax
import jax.numpy as jnp
from jax import lax
from jax.experimental import pallas as pl
from jax.experimental.pallas import tpu as pltpu


# TODO(synk): `linear(epoch)` and `log_(epoch)` are referenced but undefined in the
# source module; deterministic stand-ins are used for the weight schedules.
def linear(epoch):
    return float(epoch) / 50.0


def log_(epoch):
    return math.log(float(epoch) + 1.0)


# ---------------------------------------------------------------------------
# Kernel 1: per-sample cross entropy, classes on sublanes / batch on lanes.
# ---------------------------------------------------------------------------
def _ce_kernel(n_total, logits_ref, tgt_ref, out_ref):
    pid = pl.program_id(0)
    x = logits_ref[...].astype(jnp.float32)                 # (C, tile_n)
    c, tile_n = x.shape

    m = jnp.max(x, axis=0, keepdims=True)                   # (1, tile_n)
    z = x - m
    lse = jnp.log(jnp.sum(jnp.exp(z), axis=0, keepdims=True))

    labels = tgt_ref[...]                                    # (1, tile_n) int32
    cls = lax.broadcasted_iota(jnp.int32, (c, tile_n), 0)
    z_tgt = jnp.sum(jnp.where(cls == labels, z, 0.0), axis=0, keepdims=True)

    # TODO(synk): no ignore_index handling (matches only the default target range).
    per_row = lse - z_tgt                                     # -log softmax[target]

    col = pid * tile_n + lax.broadcasted_iota(jnp.int32, (1, tile_n), 1)
    out_ref[...] = jnp.where(col < n_total, per_row, 0.0)    # mask ragged tail


def _pick_tile_n(n, c):
    # Budget one f32 working tile at ~8 MiB (padded sublanes, 128 lanes) so the
    # double-buffered native input + f32 intermediates stay well under the
    # ~48 MiB cap (v7x has only 64 MiB VMEM/TC; v5e/v6e have 128 MiB headroom).
    c_f32 = pl.cdiv(c, 8) * 8
    budget = 8 * 1024 * 1024
    max_cols = max(128, budget // (c_f32 * 4))
    if n <= max_cols:
        return n                           # single full-extent block (always legal)
    return (max_cols // 128) * 128         # lane-aligned tile; tail masked in-kernel


def _vmem_limit_bytes(c, tile_n, itemsize):
    # Padded accounting: sublanes rounded per dtype packing, lanes rounded to 128.
    pack = max(8, 32 // itemsize)
    c_native = pl.cdiv(c, pack) * pack
    c_f32 = pl.cdiv(c, 8) * 8
    lanes = pl.cdiv(tile_n, 128) * 128
    logits_buf = c_native * lanes * itemsize          # one native logits buffer
    f32_tile = c_f32 * lanes * 4                      # one f32 working tile
    vec_buf = 8 * lanes * 4                           # (1, tile_n) padded to 8 sublanes
    est = 2 * logits_buf + 3 * f32_tile + 6 * vec_buf + (2 << 20)
    return int(min(max(est, 32 << 20), 48 << 20))


def _ce_per_row(logits_t, target_row, n):
    """logits_t: (C, N) classes-on-sublanes layout; returns (1, N) per-sample CE."""
    c, _ = logits_t.shape
    tile_n = _pick_tile_n(n, c)
    grid = (pl.cdiv(n, tile_n),)
    kernel = functools.partial(_ce_kernel, n)
    return pl.pallas_call(
        kernel,
        out_shape=jax.ShapeDtypeStruct((1, n), jnp.float32),
        grid_spec=pltpu.PrefetchScalarGridSpec(
            num_scalar_prefetch=0,
            grid=grid,
            in_specs=[
                pl.BlockSpec((c, tile_n), lambda i: (0, i)),   # logits (pipelined)
                pl.BlockSpec((1, tile_n), lambda i: (0, i)),   # targets (lane-dense)
            ],
            out_specs=pl.BlockSpec((1, tile_n), lambda i: (0, i)),
        ),
        # Every tile is independent -> "parallel" (lets v7x split across both TCs).
        compiler_params=pltpu.CompilerParams(
            dimension_semantics=("parallel",),
            vmem_limit_bytes=_vmem_limit_bytes(c, tile_n, logits_t.dtype.itemsize),
        ),
    )(logits_t, target_row)


# ---------------------------------------------------------------------------
# Kernel 2: alpha/beta entropy terms (tiny, single shot).
# ---------------------------------------------------------------------------
def _aux_kernel(alpha_ref, beta_ref, out_ref):
    # ---- loss2 (raw): entropy of softmax(streng_func(alpha[0])) ----
    a = alpha_ref[...].astype(jnp.float32)                   # (E, O)
    x = 2.0 * a
    sa = jnp.where(x < -1.0, x * x * x, x)                   # streng_func
    za = sa - jnp.max(sa, axis=-1, keepdims=True)
    ea = jnp.exp(za)
    sea = jnp.sum(ea, axis=-1, keepdims=True)
    pa = ea / sea                                             # exact softmax
    logpa = za - jnp.log(sea)                                 # log-softmax (reuse lse)
    loss2 = -jnp.sum(pa * logpa) * 3.0

    # ---- loss3 (raw): distribution + entropy terms over beta rows ----
    b = beta_ref[...].astype(jnp.float32)                     # (R, L)
    bc = jnp.where(b < 1.0, b, 1.0)                           # streng_func2
    pos_sum = jnp.sum(jnp.where(bc > 0.0, bc, 0.0), axis=-1, keepdims=True)
    nor_dis = jnp.sum(jnp.float32(0.2) * (pos_sum - 2.0) ** 2)
    zb = bc - jnp.max(bc, axis=-1, keepdims=True)
    eb = jnp.exp(zb)
    seb = jnp.sum(eb, axis=-1, keepdims=True)
    pb = eb / seb
    logpb = zb - jnp.log(seb)
    nor_ent = jnp.sum(pb * logpb)
    loss3 = (nor_dis - nor_ent) * 3.0

    out_ref[0, 0] = loss2
    out_ref[0, 1] = loss3


def _alpha_beta_entropy(alpha0, beta_rows):
    e, o = alpha0.shape
    r, l = beta_rows.shape
    return pl.pallas_call(
        _aux_kernel,
        out_shape=jax.ShapeDtypeStruct((1, 2), jnp.float32),
        grid_spec=pltpu.PrefetchScalarGridSpec(
            num_scalar_prefetch=0,
            grid=(1,),
            in_specs=[
                pl.BlockSpec((e, o), lambda i: (0, 0)),
                pl.BlockSpec((r, l), lambda i: (0, 0)),
            ],
            out_specs=pl.BlockSpec((1, 2), lambda i: (0, 0),
                                   memory_space=pltpu.MemorySpace.SMEM),
        ),
    )(alpha0, beta_rows)


# ---------------------------------------------------------------------------
# Wrapper mirroring minEntropyLoss.forward.
# ---------------------------------------------------------------------------
def min_entropy_loss(logits, target, alpha, beta, *, epoch=1, first_cell=False,
                     weight=0.1):
    """Returns (loss, weighted_loss2, weighted_loss3) like the torch module."""
    weight1 = linear(epoch)
    weight2 = log_(epoch)

    n, _ = logits.shape
    # Lane-dense CE layout: classes on sublanes, batch on lanes.
    # TODO(synk): for C >= 128 a row-major (N, C) kernel variant would avoid this
    # wrapper transpose; the class counts this loss targets are tiny, so skipped.
    logits_t = jnp.transpose(logits)                    # (C, N)
    target_row = target.reshape(1, -1).astype(jnp.int32)

    per_row = _ce_per_row(logits_t, target_row, n)      # (1, N), zeros past N
    loss1 = jnp.sum(per_row) / jnp.float32(n)           # CrossEntropyLoss (mean)

    alpha0 = alpha[0]                                   # (E, O)
    beta1 = beta[0]                                     # (>=2, L)
    beta_rows = beta1[0:1] if first_cell else beta1[0:2]
    aux = _alpha_beta_entropy(alpha0, beta_rows)
    loss2 = aux[0, 0]
    loss3 = aux[0, 1]

    c2 = jnp.float32(weight * weight1 * weight2)
    c3 = jnp.float32(weight * weight1 * 4.0)
    wl2 = c2 * loss2
    wl3 = c3 * loss3
    loss = loss1 + wl2 + wl3
    return loss, wl2, wl3


if __name__ == "__main__":
    key = jax.random.PRNGKey(0)
    k1, k2, k3, k4 = jax.random.split(key, 4)

    N, C = 8, 10            # batch, classes
    E, O = 14, 8            # alpha edges x ops (DARTS-style)
    L = 14                  # beta row length

    logits = jax.random.normal(k1, (N, C), jnp.float32)
    target = jax.random.randint(k2, (N,), 0, C, jnp.int32)
    alpha = jax.random.normal(k3, (2, E, O), jnp.float32)
    beta = jax.random.normal(k4, (2, 2, L), jnp.float32)

    loss, wl2, wl3 = min_entropy_loss(logits, target, alpha, beta,
                                      epoch=5, first_cell=False)
    jax.block_until_ready((loss, wl2, wl3))
    print("KERNEL_OK")
</pallas_src>

<mosaic_0001>
module attributes {stable_mosaic.version = 11 : i64} {
  func.func @_ce_kernel(%arg0: i32, %arg1: memref<10x8xf32, #tpu.memory_space<vmem>>, %arg2: memref<1x8xi32, #tpu.memory_space<vmem>>, %arg3: memref<1x8xf32, #tpu.memory_space<vmem>>) attributes {dimension_semantics = [#tpu.dimension_semantics<parallel>], iteration_bounds = array<i64: 1>, scalar_prefetch = 0 : i64, scratch_operands = 0 : i64, tpu.core_type = #tpu.core_type<tc>, window_params = [{transform_indices = @transform_0, window_bounds = array<i64: 10, 8>}, {transform_indices = @transform_1, window_bounds = array<i64: 1, 8>}, {transform_indices = @transform_2, window_bounds = array<i64: 1, 8>}]} {
    %c0 = arith.constant 0 : index
    %c0_0 = arith.constant 0 : index
    %0 = vector.load %arg1[%c0, %c0_0] : memref<10x8xf32, #tpu.memory_space<vmem>>, vector<10x8xf32>
    %cst = arith.constant dense<0xFF800000> : vector<8xf32>
    %1 = vector.multi_reduction <maximumf>, %0, %cst [0] : vector<10x8xf32> to vector<8xf32>
    %2 = vector.shape_cast %1 : vector<8xf32> to vector<1x8xf32>
    %3 = vector.broadcast %2 : vector<1x8xf32> to vector<10x8xf32>
    %4 = arith.subf %0, %3 : vector<10x8xf32>
    %5 = math.exp %4 : vector<10x8xf32>
    %cst_1 = arith.constant dense<0.000000e+00> : vector<8xf32>
    %6 = vector.multi_reduction <add>, %5, %cst_1 [0] : vector<10x8xf32> to vector<8xf32>
    %7 = vector.shape_cast %6 : vector<8xf32> to vector<1x8xf32>
    %8 = math.log %7 : vector<1x8xf32>
    %c0_2 = arith.constant 0 : index
    %c0_3 = arith.constant 0 : index
    %9 = vector.load %arg2[%c0_2, %c0_3] : memref<1x8xi32, #tpu.memory_space<vmem>>, vector<1x8xi32>
    %10 = tpu.iota {dimensions = array<i32: 0>} : vector<10x8xi32>
    %11 = vector.broadcast %9 : vector<1x8xi32> to vector<10x8xi32>
    %12 = arith.cmpi eq, %10, %11 : vector<10x8xi32>
    %cst_4 = arith.constant 0.000000e+00 : f32
    %13 = vector.broadcast %cst_4 : f32 to vector<10x8xf32>
    %14 = arith.select %12, %4, %13 : vector<10x8xi1>, vector<10x8xf32>
    %cst_5 = arith.constant dense<0.000000e+00> : vector<8xf32>
    %15 = vector.multi_reduction <add>, %14, %cst_5 [0] : vector<10x8xf32> to vector<8xf32>
    %16 = vector.shape_cast %15 : vector<8xf32> to vector<1x8xf32>
    %17 = arith.subf %8, %16 : vector<1x8xf32>
    %c8_i32 = arith.constant 8 : i32
    %18 = arith.muli %arg0, %c8_i32 : i32
    %19 = tpu.iota {dimensions = array<i32: 1>} : vector<1x8xi32>
    %20 = vector.broadcast %18 : i32 to vector<1x8xi32>
    %21 = arith.addi %20, %19 : vector<1x8xi32>
    %c8_i32_6 = arith.constant 8 : i32
    %22 = vector.broadcast %c8_i32_6 : i32 to vector<1x8xi32>
    %23 = arith.cmpi slt, %21, %22 : vector<1x8xi32>
    %cst_7 = arith.constant 0.000000e+00 : f32
    %24 = vector.broadcast %cst_7 : f32 to vector<1x8xf32>
    %25 = arith.select %23, %17, %24 : vector<1x8xi1>, vector<1x8xf32>
    %c0_8 = arith.constant 0 : index
    %c0_9 = arith.constant 0 : index
    %26 = vector.load %arg3[%c0_8, %c0_9] : memref<1x8xf32, #tpu.memory_space<vmem>>, vector<1x8xf32>
    tpu.vector_store %arg3[%c0_8, %c0_9], %25 {strides = array<i32>} : memref<1x8xf32, #tpu.memory_space<vmem>>, vector<1x8xf32>,
    return
  }
  func.func @transform_0(%arg0: i32) -> (i32, i32) {
    %c0_i32 = arith.constant 0 : i32
    %c0_i32_0 = arith.constant 0 : i32
    return %c0_i32, %arg0 : i32, i32
  }
  func.func @transform_1(%arg0: i32) -> (i32, i32) {
    %c0_i32 = arith.constant 0 : i32
    %c0_i32_0 = arith.constant 0 : i32
    return %c0_i32, %arg0 : i32, i32
  }
  func.func @transform_2(%arg0: i32) -> (i32, i32) {
    %c0_i32 = arith.constant 0 : i32
    %c0_i32_0 = arith.constant 0 : i32
    return %c0_i32, %arg0 : i32, i32
  }
}

</mosaic_0001>

<bundles_post_ra>
// kernel: tpu_custom_call.1
= control target key start
LH: loop header
LB: loop body
LE: loop exit
PB: predicated region body
PF: predicated region fallthrough
CT: control target
= control target key end

     0   :  { %vm14_vm0 = vcmask 64512   ;;  %vm16_vm1 = vcmask 58368   ;;  %s151_s0 = inlined_call_operand.vmem [shape: f32[10,8], index: 0, kind: input, shape index: {}]   ;;  %s152_s1 = inlined_call_operand.vmem [shape: s32[1,8], index: 1, kind: input, shape index: {}]   ;;  %s153_s2 = inlined_call_operand.hbm [shape: f32[1,8], index: 2, kind: output, shape index: {}]  }
   0x1   :  { %v12_v0 = vld [vmem:[%s151_s0] sm:$0xff]  ;;  %v13_v1 = vld [vmem:[%s151_s0 + $0x8] sm:$0x3] }
   0x2   :  { %v15_v2 = vsel %vm14_vm0, %v12_v0, -inf  ;;  %v17_v3 = vsel %vm16_vm1, %v13_v1, -inf }
   0x3   :  { %7 = vsyncpa [#allocation3], 0  ;;  %v18_v4 = vmax.f32 %v15_v2, %v17_v3  ;;  %v43_v13 = vlaneseq  ;;  %v87_v18 = vld [vmem:[%s152_s1] ss:$0 sm:$0xff]  ;;  %s117_s1 = smov [#allocation2]   ;;  %vm71_vm5 = vcmask 57344  }
   0x4   :  { %s79_s14 = sshll.u32 %s117_s1, 4  ;;  %s80_s14 = int_to_ptr.vmem [resolvable:$true] %s79_s14 }
   0x5   :  { %v19_v5 = vrot.slane %v18_v4, 4  ;;  %v44_v16 = vshrl.u32 %v43_v13, 7  ;;  %v66_v40 = vand.u32 127, %v43_v13  ;;  %s95_s15 = scalar_lea.vmem %s80_s14, 16  ;;  %s99_s16 = scalar_lea.vmem %s80_s14, 32 }
   0x6   :  { %p96_p0 = scmp.ne.s32.totalorder %s80_s14, %s95_s15  ;;  %p100_p1 = scmp.lt.s32.totalorder %s80_s14, %s80_s14 }
   0x7   :  { %v20_v6 = vmax.f32 %v18_v4, %v19_v5  ;;  %v45_v17 = vadd.s32 8, %v44_v16  ;;  %vm50_vm2 = vcmp.eq.s32.totalorder %v44_v16, %v87_v18  ;;  %vm69_vm4 = vcmp.lt.s32.totalorder %v66_v40, 8  ;;  %p101_p2 = scmp.lt.s32.totalorder %s99_s16, %s95_s15 }
   0x9   :  { %v21_v7 = vrot.slane %v20_v6, 2  ;;  %vm51_vm3 = vcmp.eq.s32.totalorder %v45_v17, %v87_v18  ;;  %p102_p3 = por %p101_p2, %p100_p1 }
   0xb   :  { %v22_v8 = vmax.f32 %v20_v6, %v21_v7  ;;  %p103_p4 = pnand %p102_p3, %p96_p0 }
   0xd   :  { %v23_v9 = vrot.slane %v22_v8, 1 }
   0xf   :  { %v24_v10 = vmax.f32 %v22_v8, %v23_v9 }
  0x11   :  { %v25_v11 = vsub.f32 %v12_v0, %v24_v10  ;;  %v26_v12 = vsub.f32 %v13_v1, %v24_v10 }
  0x13   :  { %v27_v14 = vmul.f32 1.442695, %v25_v11  ;;  %v29_v15 = vmul.f32 1.442695, %v26_v12  ;;  %v52_v19 = vsel %vm50_vm2, %v25_v11, 0.0  ;;  %v53_v20 = vsel %vm51_vm3, %v26_v12, 0.0 }
  0x14   :  { %v54_v25 = vsel %vm14_vm0, %v52_v19, 0.0  ;;  %v55_v26 = vsel %vm16_vm1, %v53_v20, 0.0 }
  0x15   :  { %89 = vpow2.f32 %v27_v14  ;;  %v56_v29 = vadd.f32 %v55_v26, %v54_v25 }
  0x16   :  { %91 = vpow2.f32 %v29_v15 }
  0x17   :  { %v57_v32 = vrot.slane %v56_v29, 4 }
  0x19   :  { %v58_v35 = vadd.f32 %v57_v32, %v56_v29 }
  0x1b   :  { %v59_v37 = vrot.slane %v58_v35, 2 }
  0x1d   :  { %v60_v38 = vadd.f32 %v59_v37, %v58_v35 }
  0x1f   :  { %v61_v39 = vrot.slane %v60_v38, 1 }
  0x21   :  { %v62_v41 = vadd.f32 %v61_v39, %v60_v38 }
  0x22   :  { %v90_v21 = vpop.eup %89 }
  0x23   :  { %v92_v22 = vpop.eup %91  ;;  %v31_v23 = vsel %vm14_vm0, %v90_v21, 0.0 }
  0x24   :  { %v32_v24 = vsel %vm16_vm1, %v92_v22, 0.0 }
  0x25   :  { %v33_v27 = vadd.f32 %v32_v24, %v31_v23 }
  0x27   :  { %v34_v28 = vrot.slane %v33_v27, 4 }
  0x29   :  { %v35_v30 = vadd.f32 %v34_v28, %v33_v27 }
  0x2b   :  { %v36_v31 = vrot.slane %v35_v30, 2 }
  0x2d   :  { %v37_v33 = vadd.f32 %v36_v31, %v35_v30 }
  0x2f   :  { %v38_v34 = vrot.slane %v37_v33, 1 }
  0x31   :  { %v39_v36 = vadd.f32 %v38_v34, %v37_v33 }
  0x33   :  { %93 = vlog2.f32 %v39_v36 }
  0x40   :  { %v94_v42 = vpop.eup %93 }
  0x41   :  { %v41_v43 = vmul.f32 0.6931472, %v94_v42 }
  0x43   :  { %v63_v44 = vsub.f32 %v41_v43, %v62_v41 }
  0x45   :  { %v70_v45 = vsel %vm69_vm4, %v63_v44, 0.0 }
  0x46   :  { %72 = vst.msk [vmem:[#allocation2] sm:$0x1] %vm71_vm5, %v70_v45 }
  0x47   :  { %106 = shalt.err (!%p103_p4)
}
  0x48   :  { %82 = dma.vmem_to_hbm [thread:$0]  %s80_s14, 16, %s153_s2, [#allocation3]  }
  0x49   :  { %115 = dma.done.wait [#allocation3], 16  }
  0x4a   :  { %116 = vsyncadd [#allocation3], 4294967280 }
  0x4b   :  { %86 = vsyncpa [#allocation3], 1 }

</bundles_post_ra>
